<compile_context>
chip_gen: v7x
topology: tpu7x:2x2x1
jax: 0.10.0
libtpu: 0.0.40
codegen_flags: <defaults>
</compile_context>

<pallas_src>
import functools

import jax
import jax.numpy as jnp
from jax import lax
from jax.experimental import pallas as pl
from jax.experimental.pallas import tpu as pltpu


def _ls_ce_kernel(x_ref, tgt_ref, loss_ref, *, smoothing, confidence):
    """Per-tile: log-sum-exp over classes, one-hot gather, smoothed loss.

    x_ref:    (tile_n, C)  logits (any float dtype; upcast to f32 in-kernel)
    tgt_ref:  (tile_n, 1)  int32 class indices
    loss_ref: (tile_n, 1)  per-sample loss (output, f32)
    """
    logits = x_ref[...].astype(jnp.float32)                      # (tn, C)
    tn, C = logits.shape

    # Numerically-stable log-sum-exp along the class (lane) axis.
    m = jnp.max(logits, axis=-1, keepdims=True)                  # (tn, 1)
    lse = m + jnp.log(jnp.sum(jnp.exp(logits - m), axis=-1, keepdims=True))

    # gather(dim=-1, index=target) via one-hot select (no dynamic gather on TPU).
    cls = lax.broadcasted_iota(jnp.int32, (tn, C), 1)
    onehot = cls == tgt_ref[...]                                 # (tn,1) -> (tn,C)
    gathered = jnp.sum(jnp.where(onehot, logits, 0.0), axis=-1, keepdims=True)
    row_sum = jnp.sum(logits, axis=-1, keepdims=True)

    # nll    = -(logits[target] - lse)      = lse - gathered
    # smooth = -mean(logits - lse, axis=-1) = lse - row_sum / C
    nll = lse - gathered                                         # (tn, 1)
    smooth = lse - row_sum * (1.0 / C)                           # (tn, 1)

    loss_ref[...] = confidence * nll + smoothing * smooth


def _pick_tile_n(n, c, itemsize, per_buffer_bytes=12 * 1024 * 1024, max_tile=1024):
    """Largest row-tile (multiple of 8) whose logits buffer fits the VMEM budget."""
    rows = max(per_buffer_bytes // max(c * itemsize, 1), 8)
    tile = min(max_tile, rows, n)
    if tile >= 8:
        tile = (tile // 8) * 8
    else:
        tile = n  # tiny batch: full-extent block satisfies the (8,128) rule
    return max(tile, 1)


def label_smoothing_cross_entropy(x, target, *, smoothing=0.1,
                                  reduction="mean", tile_n=None):
    """Pallas implementation of LabelSmoothingCrossEntropyWithReduction.forward."""
    assert reduction in (None, "mean", "sum")
    assert smoothing < 1.0
    N, C = x.shape
    confidence = 1.0 - smoothing

    if tile_n is None:
        tile_n = _pick_tile_n(N, C, jnp.dtype(x.dtype).itemsize)
    grid_n = pl.cdiv(N, tile_n)

    tgt2d = target.astype(jnp.int32).reshape(N, 1)
    kernel = functools.partial(_ls_ce_kernel,
                               smoothing=float(smoothing),
                               confidence=float(confidence))

    # TODO(synk): add a second grid axis over C with an online logsumexp for
    # very large vocabularies (C >~ 64K) to keep tiles large on v7x's 64 MiB VMEM.
    loss_per = pl.pallas_call(
        kernel,
        out_shape=jax.ShapeDtypeStruct((N, 1), jnp.float32),
        grid=(grid_n,),
        in_specs=[
            pl.BlockSpec((tile_n, C), lambda i: (i, 0)),   # logits tile
            pl.BlockSpec((tile_n, 1), lambda i: (i, 0)),   # targets tile
        ],
        out_specs=pl.BlockSpec((tile_n, 1), lambda i: (i, 0)),   # per-sample loss
        compiler_params=pltpu.CompilerParams(
            dimension_semantics=("parallel",),             # no cross-tile state
            vmem_limit_bytes=48 * 1024 * 1024,
        ),
    )(x, tgt2d)

    loss = loss_per[:, 0]                                  # (N,)
    if reduction == "mean":
        return loss.mean()
    elif reduction == "sum":
        return loss.sum()
    else:  # None -> per-sample loss
        return loss


def _reference(x, target, smoothing=0.1, reduction="mean"):
    logprobs = jax.nn.log_softmax(x.astype(jnp.float32), axis=-1)
    nll = -jnp.take_along_axis(logprobs, target[:, None], axis=-1)[:, 0]
    smooth = -jnp.mean(logprobs, axis=-1)
    loss = (1.0 - smoothing) * nll + smoothing * smooth
    if reduction == "mean":
        return loss.mean()
    if reduction == "sum":
        return loss.sum()
    return loss


if __name__ == "__main__":
    key = jax.random.PRNGKey(0)
    kx, kt = jax.random.split(key)
    N, C = 8, 32
    x = jax.random.normal(kx, (N, C), dtype=jnp.float32)
    target = jax.random.randint(kt, (N,), 0, C, dtype=jnp.int32)

    out_mean = jax.block_until_ready(
        label_smoothing_cross_entropy(x, target, smoothing=0.1, reduction="mean"))
    out_sum = jax.block_until_ready(
        label_smoothing_cross_entropy(x, target, smoothing=0.1, reduction="sum"))
    out_none = jax.block_until_ready(
        label_smoothing_cross_entropy(x, target, smoothing=0.1, reduction=None))

    ref_mean = _reference(x, target, 0.1, "mean")
    ref_sum = _reference(x, target, 0.1, "sum")
    ref_none = _reference(x, target, 0.1, None)

    assert jnp.allclose(out_mean, ref_mean, atol=1e-5, rtol=1e-5)
    assert jnp.allclose(out_sum, ref_sum, atol=1e-5, rtol=1e-5)
    assert jnp.allclose(out_none, ref_none, atol=1e-5, rtol=1e-5)

    print("KERNEL_OK")
</pallas_src>

<mosaic_0001>
module attributes {stable_mosaic.version = 11 : i64} {
  func.func @_ls_ce_kernel(%arg0: i32, %arg1: memref<8x32xf32, #tpu.memory_space<vmem>>, %arg2: memref<8x1xi32, #tpu.memory_space<vmem>>, %arg3: memref<8x1xf32, #tpu.memory_space<vmem>>) attributes {dimension_semantics = [#tpu.dimension_semantics<parallel>], iteration_bounds = array<i64: 1>, scalar_prefetch = 0 : i64, scratch_operands = 0 : i64, tpu.core_type = #tpu.core_type<tc>, window_params = [{transform_indices = @transform_0, window_bounds = array<i64: 8, 32>}, {transform_indices = @transform_1, window_bounds = array<i64: 8, 1>}, {transform_indices = @transform_2, window_bounds = array<i64: 8, 1>}]} {
    %c0 = arith.constant 0 : index
    %c0_0 = arith.constant 0 : index
    %0 = vector.load %arg1[%c0, %c0_0] : memref<8x32xf32, #tpu.memory_space<vmem>>, vector<8x32xf32>
    %cst = arith.constant dense<0xFF800000> : vector<8xf32>
    %1 = vector.multi_reduction <maximumf>, %0, %cst [1] : vector<8x32xf32> to vector<8xf32>
    %2 = vector.shape_cast %1 : vector<8xf32> to vector<8x1xf32>
    %3 = vector.broadcast %2 : vector<8x1xf32> to vector<8x32xf32>
    %4 = arith.subf %0, %3 : vector<8x32xf32>
    %5 = math.exp %4 : vector<8x32xf32>
    %cst_1 = arith.constant dense<0.000000e+00> : vector<8xf32>
    %6 = vector.multi_reduction <add>, %5, %cst_1 [1] : vector<8x32xf32> to vector<8xf32>
    %7 = vector.shape_cast %6 : vector<8xf32> to vector<8x1xf32>
    %8 = math.log %7 : vector<8x1xf32>
    %9 = arith.addf %2, %8 : vector<8x1xf32>
    %10 = tpu.iota {dimensions = array<i32: 1>} : vector<8x32xi32>
    %c0_2 = arith.constant 0 : index
    %c0_3 = arith.constant 0 : index
    %11 = vector.load %arg2[%c0_2, %c0_3] : memref<8x1xi32, #tpu.memory_space<vmem>>, vector<8x1xi32>
    %12 = vector.broadcast %11 : vector<8x1xi32> to vector<8x32xi32>
    %13 = arith.cmpi eq, %10, %12 : vector<8x32xi32>
    %cst_4 = arith.constant 0.000000e+00 : f32
    %14 = vector.broadcast %cst_4 : f32 to vector<8x32xf32>
    %15 = arith.select %13, %0, %14 : vector<8x32xi1>, vector<8x32xf32>
    %cst_5 = arith.constant dense<0.000000e+00> : vector<8xf32>
    %16 = vector.multi_reduction <add>, %15, %cst_5 [1] : vector<8x32xf32> to vector<8xf32>
    %17 = vector.shape_cast %16 : vector<8xf32> to vector<8x1xf32>
    %cst_6 = arith.constant dense<0.000000e+00> : vector<8xf32>
    %18 = vector.multi_reduction <add>, %0, %cst_6 [1] : vector<8x32xf32> to vector<8xf32>
    %19 = vector.shape_cast %18 : vector<8xf32> to vector<8x1xf32>
    %20 = arith.subf %9, %17 : vector<8x1xf32>
    %cst_7 = arith.constant 3.125000e-02 : f32
    %21 = vector.broadcast %cst_7 : f32 to vector<8x1xf32>
    %22 = arith.mulf %19, %21 : vector<8x1xf32>
    %23 = arith.subf %9, %22 : vector<8x1xf32>
    %cst_8 = arith.constant 0.899999976 : f32
    %24 = vector.broadcast %cst_8 : f32 to vector<8x1xf32>
    %25 = arith.mulf %24, %20 : vector<8x1xf32>
    %cst_9 = arith.constant 1.000000e-01 : f32
    %26 = vector.broadcast %cst_9 : f32 to vector<8x1xf32>
    %27 = arith.mulf %26, %23 : vector<8x1xf32>
    %28 = arith.addf %25, %27 : vector<8x1xf32>
    %c0_10 = arith.constant 0 : index
    %c0_11 = arith.constant 0 : index
    %29 = vector.load %arg3[%c0_10, %c0_11] : memref<8x1xf32, #tpu.memory_space<vmem>>, vector<8x1xf32>
    tpu.vector_store %arg3[%c0_10, %c0_11], %28 {strides = array<i32>} : memref<8x1xf32, #tpu.memory_space<vmem>>, vector<8x1xf32>,
    return
  }
  func.func @transform_0(%arg0: i32) -> (i32, i32) {
    %c0_i32 = arith.constant 0 : i32
    %c0_i32_0 = arith.constant 0 : i32
    return %arg0, %c0_i32 : i32, i32
  }
  func.func @transform_1(%arg0: i32) -> (i32, i32) {
    %c0_i32 = arith.constant 0 : i32
    %c0_i32_0 = arith.constant 0 : i32
    return %arg0, %c0_i32 : i32, i32
  }
  func.func @transform_2(%arg0: i32) -> (i32, i32) {
    %c0_i32 = arith.constant 0 : i32
    %c0_i32_0 = arith.constant 0 : i32
    return %arg0, %c0_i32 : i32, i32
  }
}

</mosaic_0001>

<bundles_post_ra>
// kernel: tpu_custom_call.1
= control target key start
LH: loop header
LB: loop body
LE: loop exit
PB: predicated region body
PF: predicated region fallthrough
CT: control target
= control target key end

     0   :  { %vm12_vm0 = vcmask 261120   ;;  %v57_v1 = vmov 0   ;;  %v25_v7 = vlaneseq  ;;  %vm45_vm2 = vcmask 7168   ;;  %s86_s0 = inlined_call_operand.vmem [shape: f32[8,32], index: 0, kind: input, shape index: {}]   ;;  %s87_s1 = inlined_call_operand.vmem [shape: s32[8,1], index: 1, kind: input, shape index: {}]   ;;  %s88_s2 = inlined_call_operand.vmem [shape: f32[8,1], index: 2, kind: output, shape index: {}]  }
   0x1   :  { %v11_v0 = vld [vmem:[%s86_s0] sm:$0xff]  ;;  %52 = vset.pattern.permute.xlu0 %v57_v1 }
   0x2   :  { %v13_v2 = vsel %vm12_vm0, %v11_v0, -inf  ;;  %v27_v3 = vld [vmem:[%s87_s1] sm:$0xff]  ;;  %v26_v8 = vand.u32 127, %v25_v7  ;;  %v36_v12 = vsel %vm12_vm0, %v11_v0, 0.0 }
   0x3   :  { %14 = vmax.xlane.f32.xlu0 %v13_v2 }
  0x19   :  { %29 = vperm.xlu0 %52, %v27_v3  }
  0x90   :  { %v15_v4 = vpop.xlane.xlu0 %14 }
  0x91   :  { %v16_v5 = vsub.f32 %v11_v0, %v15_v4 }
  0x93   :  { %v17_v6 = vmul.f32 1.442695, %v16_v5 }
  0x95   :  { %53 = vpow2.f32 %v17_v6 }
  0x98   :  { %v30_v9 = vpop.permute.xlu0 %29 }
  0x99   :  { %vm31_vm1 = vcmp.eq.s32.totalorder %v26_v8, %v30_v9 }
  0x9a   :  { %v32_v13 = vsel %vm31_vm1, %v11_v0, 0.0 }
  0x9b   :  { %v33_v14 = vsel %vm12_vm0, %v32_v13, 0.0 }
  0x9f   :  { %v54_v10 = vpop.eup %53 }
  0xa0   :  { %v19_v11 = vsel %vm12_vm0, %v54_v10, 0.0 }
  0xa1   :  { %20 = vadd.xlane.f32.xlu1 %v19_v11 }
  0xa5   :  { %37 = vadd.xlane.f32.xlu1 %v36_v12 }
  0xa9   :  { %34 = vadd.xlane.f32.xlu1 %v33_v14 }
 0x12e   :  { %v21_v15 = vpop.xlane.xlu1 %20 }
 0x12f   :  { %55 = vlog2.f32 %v21_v15 }
 0x132   :  { %v38_v16 = vpop.xlane.xlu1 %37 }
 0x133   :  { %v40_v21 = vmul.f32 0.03125, %v38_v16 }
 0x136   :  { %v35_v19 = vpop.xlane.xlu1 %34 }
 0x139   :  { %v56_v17 = vpop.eup %55 }
 0x13a   :  { %v23_v18 = vmul.f32 0.6931472, %v56_v17 }
 0x13c   :  { %v24_v20 = vadd.f32 %v23_v18, %v15_v4 }
 0x13e   :  { %v41_v22 = vsub.f32 %v24_v20, %v40_v21  ;;  %v39_v23 = vsub.f32 %v24_v20, %v35_v19 }
 0x140   :  { %v43_v24 = vmul.f32 0.1, %v41_v22  ;;  %v42_v25 = vmul.f32 0.9, %v39_v23 }
 0x142   :  { %v44_v26 = vadd.f32 %v43_v24, %v42_v25 }
 0x144   :  { %46 = vst.msk [vmem:[%s88_s2] sm:$0xff] %vm45_vm2, %v44_v26 }

</bundles_post_ra>
